<compile_context>
chip_gen: v7x
topology: tpu7x:2x2x1
jax: 0.10.0
libtpu: 0.0.40
codegen_flags: <defaults>
</compile_context>

<pallas_src>
import functools

import jax
import jax.numpy as jnp
import numpy as np
from jax import lax
from jax.experimental import pallas as pl
from jax.experimental.pallas import tpu as pltpu


def _vmem_limit_bytes():
    cap = 64 * 1024 * 1024
    try:
        cap = int(pltpu.get_tpu_info().vmem_capacity_bytes)
    except Exception:
        pass
    return int(cap * 3 // 4)


# ---------------------------------------------------------------------------
# host-side constant tables (tiny, built once at trace time)
# ---------------------------------------------------------------------------
def _pool_selector(h, w):
    """0/1 matrix P (H*W, Hp*Wp): P[s, p] = 1 iff s is the top-left corner of window p."""
    hp, wp = h // 2, w // 2
    s = np.arange(h * w)
    hh, ww = np.divmod(s, w)
    keep = (hh % 2 == 0) & (ww % 2 == 0)
    col = (hh // 2) * wp + (ww // 2)
    sel = np.zeros((h * w, hp * wp), np.float32)
    sel[s[keep], col[keep]] = 1.0
    return jnp.asarray(sel)


def _tap_masks(hp, wp):
    """(9, Hp*Wp) 0/1 validity masks for the 3x3 taps on the flattened spatial axis."""
    ii, jj = np.divmod(np.arange(hp * wp), wp)
    rows = []
    for dh in (-1, 0, 1):
        for dw in (-1, 0, 1):
            ok = (ii + dh >= 0) & (ii + dh < hp) & (jj + dw >= 0) & (jj + dw < wp)
            rows.append(ok.astype(np.float32))
    return jnp.asarray(np.stack(rows))


# ---------------------------------------------------------------------------
# fused kernel: pool -> dw3x3 -> pw1x1(+BN+ReLU) -> dw3x3 -> pw1x1(+BN+ReLU)
# ---------------------------------------------------------------------------
def _down_ds_kernel(x_ref, psel_ref, mask_ref,
                    wd1_ref, bd1_ref, wp1_ref, bp1_ref,
                    wd2_ref, bd2_ref, wp2_ref, bp2_ref,
                    o_ref, *, img_w, half_w):
    s = x_ref.shape[2]        # H * W
    sp = o_ref.shape[2]       # (H/2) * (W/2)

    x = x_ref[0].astype(jnp.float32)                                   # (Cin, S)

    # -- MaxPool2d(2): pair-max with right neighbour / row below (XLU lane rolls),
    #    then compact the even/even anchors with one 0/1 selection matmul (MXU). --
    m = jnp.maximum(x, pltpu.roll(x, shift=s - 1, axis=1))
    m = jnp.maximum(m, pltpu.roll(m, shift=s - img_w, axis=1))
    pooled = jnp.dot(m, psel_ref[...], preferred_element_type=jnp.float32)   # (Cin, Sp)

    # -- depthwise 3x3, padding=1: 8 lane rolls + precomputed boundary masks. --
    def dw3x3(v, w_ref, b_ref):
        acc = w_ref[:, 4:5] * v                       # centre tap: no roll, no mask
        t = 0
        for dh in (-1, 0, 1):
            for dw in (-1, 0, 1):
                if dh == 0 and dw == 0:
                    t += 1
                    continue
                shift = (-(dh * half_w + dw)) % sp
                tap = pltpu.roll(v, shift=shift, axis=1) * mask_ref[t][None, :]
                acc = acc + w_ref[:, t:t + 1] * tap
                t += 1
        return acc + b_ref[...]

    # -- pointwise 1x1 conv with folded BatchNorm + ReLU (bf16/f32 MXU, f32 accum) --
    def pw_bn_relu(v, w_ref, b_ref):
        y = jnp.dot(w_ref[...], v.astype(w_ref.dtype),
                    preferred_element_type=jnp.float32)
        return jnp.maximum(y + b_ref[...], 0.0)

    y = dw3x3(pooled, wd1_ref, bd1_ref)               # (Cin,  Sp)
    y = pw_bn_relu(y, wp1_ref, bp1_ref)               # (Cmid, Sp)
    y = dw3x3(y, wd2_ref, bd2_ref)                    # (Cmid, Sp)
    y = pw_bn_relu(y, wp2_ref, bp2_ref)               # (Cout, Sp)
    o_ref[0] = y.astype(o_ref.dtype)


# ---------------------------------------------------------------------------
# wrapper
# ---------------------------------------------------------------------------
def _fold_bn(pw_w, pw_b, gamma, beta, mean, var, eps=1e-5):
    """Fold eval-mode BatchNorm into the 1x1 conv weight/bias."""
    w2 = pw_w.reshape(pw_w.shape[0], pw_w.shape[1]).astype(jnp.float32)
    scale = gamma / jnp.sqrt(var + eps)
    return w2 * scale[:, None], (pw_b - mean) * scale + beta


def down_ds_forward(x, params, compute_dtype=jnp.bfloat16):
    """DownDS forward: maxpool(2) -> (dw3x3 -> pw1x1 -> BN -> ReLU) x 2."""
    n, cin, h, w = x.shape
    assert h % 2 == 0 and w % 2 == 0, "MaxPool2d(2) kernel assumes even H and W"
    hp, wp = h // 2, w // 2
    s, sp = h * w, hp * wp
    cmid = params['pw1_w'].shape[0]
    cout = params['pw2_w'].shape[0]

    # tiny parameter preprocessing (XLA side, negligible)
    wd1 = params['dw1_w'].reshape(cin, 9).astype(jnp.float32)
    bd1 = params['dw1_b'].reshape(cin, 1).astype(jnp.float32)
    wd2 = params['dw2_w'].reshape(cmid, 9).astype(jnp.float32)
    bd2 = params['dw2_b'].reshape(cmid, 1).astype(jnp.float32)
    w1, b1 = _fold_bn(params['pw1_w'], params['pw1_b'], params['bn1_g'],
                      params['bn1_b'], params['bn1_m'], params['bn1_v'])
    w2, b2 = _fold_bn(params['pw2_w'], params['pw2_b'], params['bn2_g'],
                      params['bn2_b'], params['bn2_m'], params['bn2_v'])
    w1 = w1.astype(compute_dtype)
    w2 = w2.astype(compute_dtype)
    b1 = b1.reshape(cmid, 1).astype(jnp.float32)
    b2 = b2.reshape(cout, 1).astype(jnp.float32)

    psel = _pool_selector(h, w)      # (S, Sp)  0/1
    mask9 = _tap_masks(hp, wp)       # (9, Sp)  0/1

    x3 = x.reshape(n, cin, s)        # free row-major view: NCHW -> (N, C, H*W)

    kernel = functools.partial(_down_ds_kernel, img_w=w, half_w=wp)
    const = lambda i: (0, 0)
    out3 = pl.pallas_call(
        kernel,
        out_shape=jax.ShapeDtypeStruct((n, cout, sp), x.dtype),
        grid_spec=pltpu.PrefetchScalarGridSpec(
            num_scalar_prefetch=0,
            grid=(n,),
            in_specs=[
                pl.BlockSpec((1, cin, s), lambda i: (i, 0, 0)),   # activations
                pl.BlockSpec((s, sp), const),                     # pooling selector
                pl.BlockSpec((9, sp), const),                     # dw boundary masks
                pl.BlockSpec((cin, 9), const),                    # dw1 weights
                pl.BlockSpec((cin, 1), const),                    # dw1 bias
                pl.BlockSpec((cmid, cin), const),                 # pw1 (BN folded)
                pl.BlockSpec((cmid, 1), const),
                pl.BlockSpec((cmid, 9), const),                   # dw2 weights
                pl.BlockSpec((cmid, 1), const),                   # dw2 bias
                pl.BlockSpec((cout, cmid), const),                # pw2 (BN folded)
                pl.BlockSpec((cout, 1), const),
            ],
            out_specs=pl.BlockSpec((1, cout, sp), lambda i: (i, 0, 0)),
        ),
        compiler_params=pltpu.CompilerParams(
            dimension_semantics=("parallel",),
            vmem_limit_bytes=_vmem_limit_bytes()),
    )(x3, psel, mask9, wd1, bd1, w1, b1, wd2, bd2, w2, b2)
    return out3.reshape(n, cout, hp, wp)


# ---------------------------------------------------------------------------
# pure-JAX reference
# ---------------------------------------------------------------------------
def ref_forward(x, p, eps=1e-5):
    hi = lax.Precision.HIGHEST
    n, c, h, w = x.shape
    y = x.reshape(n, c, h // 2, 2, w // 2, 2).max(axis=(3, 5))

    def dwconv(z, wgt, b):
        out = lax.conv_general_dilated(
            z, wgt, window_strides=(1, 1), padding=((1, 1), (1, 1)),
            dimension_numbers=('NCHW', 'OIHW', 'NCHW'),
            feature_group_count=z.shape[1], precision=hi)
        return out + b[None, :, None, None]

    def pw_bn_relu(z, wgt, b, g, bt, m, v):
        o = jnp.einsum('nchw,oc->nohw', z,
                       wgt.reshape(wgt.shape[0], wgt.shape[1]), precision=hi)
        o = o + b[None, :, None, None]
        o = (o - m[None, :, None, None]) * (g / jnp.sqrt(v + eps))[None, :, None, None] \
            + bt[None, :, None, None]
        return jnp.maximum(o, 0.0)

    y = dwconv(y, p['dw1_w'], p['dw1_b'])
    y = pw_bn_relu(y, p['pw1_w'], p['pw1_b'], p['bn1_g'], p['bn1_b'], p['bn1_m'], p['bn1_v'])
    y = dwconv(y, p['dw2_w'], p['dw2_b'])
    y = pw_bn_relu(y, p['pw2_w'], p['pw2_b'], p['bn2_g'], p['bn2_b'], p['bn2_m'], p['bn2_v'])
    return y


if __name__ == "__main__":
    key = jax.random.PRNGKey(0)
    ks = jax.random.split(key, 17)

    N, Cin, Cout, H, W = 2, 4, 8, 16, 16
    Cmid = Cout  # DoubleConvDS default: mid_channels = out_channels

    def u(k, shape, fan_in):
        b = 1.0 / (fan_in ** 0.5)
        return jax.random.uniform(k, shape, jnp.float32, -b, b)

    x = jax.random.normal(ks[0], (N, Cin, H, W), jnp.float32)
    params = {
        'dw1_w': u(ks[1], (Cin, 1, 3, 3), 9),
        'dw1_b': u(ks[2], (Cin,), 9),
        'pw1_w': u(ks[3], (Cmid, Cin, 1, 1), Cin),
        'pw1_b': u(ks[4], (Cmid,), Cin),
        'bn1_g': 1.0 + 0.1 * jax.random.normal(ks[5], (Cmid,), jnp.float32),
        'bn1_b': 0.1 * jax.random.normal(ks[6], (Cmid,), jnp.float32),
        'bn1_m': 0.1 * jax.random.normal(ks[7], (Cmid,), jnp.float32),
        'bn1_v': jax.random.uniform(ks[8], (Cmid,), jnp.float32, 0.5, 1.5),
        'dw2_w': u(ks[9], (Cmid, 1, 3, 3), 9),
        'dw2_b': u(ks[10], (Cmid,), 9),
        'pw2_w': u(ks[11], (Cout, Cmid, 1, 1), Cmid),
        'pw2_b': u(ks[12], (Cout,), Cmid),
        'bn2_g': 1.0 + 0.1 * jax.random.normal(ks[13], (Cout,), jnp.float32),
        'bn2_b': 0.1 * jax.random.normal(ks[14], (Cout,), jnp.float32),
        'bn2_m': 0.1 * jax.random.normal(ks[15], (Cout,), jnp.float32),
        'bn2_v': jax.random.uniform(ks[16], (Cout,), jnp.float32, 0.5, 1.5),
    }

    ref = ref_forward(x, params)

    # strict correctness check with f32 MXU operands
    y32 = jax.jit(functools.partial(down_ds_forward, compute_dtype=jnp.float32))(x, params)
    jax.block_until_ready(y32)
    assert y32.shape == (N, Cout, H // 2, W // 2), y32.shape
    assert jnp.allclose(y32, ref, atol=1e-2, rtol=1e-2), \
        f"f32 mismatch vs reference, max abs err = {jnp.max(jnp.abs(y32 - ref))}"

    # default (performance) path: bf16 MXU operands for the pointwise convs
    ybf = jax.jit(down_ds_forward)(x, params)
    jax.block_until_ready(ybf)
    assert ybf.shape == (N, Cout, H // 2, W // 2), ybf.shape
    assert jnp.allclose(ybf, ref, atol=1e-1, rtol=1e-1), \
        f"bf16 mismatch vs reference, max abs err = {jnp.max(jnp.abs(ybf - ref))}"

    print("KERNEL_OK")
</pallas_src>

<mosaic_0001>
module attributes {stable_mosaic.version = 11 : i64} {
  func.func @_down_ds_kernel(%arg0: i32, %arg1: memref<1x4x256xf32, #tpu.memory_space<vmem>>, %arg2: memref<256x64xf32, #tpu.memory_space<vmem>>, %arg3: memref<9x64xf32, #tpu.memory_space<vmem>>, %arg4: memref<4x9xf32, #tpu.memory_space<vmem>>, %arg5: memref<4x1xf32, #tpu.memory_space<vmem>>, %arg6: memref<8x4xf32, #tpu.memory_space<vmem>>, %arg7: memref<8x1xf32, #tpu.memory_space<vmem>>, %arg8: memref<8x9xf32, #tpu.memory_space<vmem>>, %arg9: memref<8x1xf32, #tpu.memory_space<vmem>>, %arg10: memref<8x8xf32, #tpu.memory_space<vmem>>, %arg11: memref<8x1xf32, #tpu.memory_space<vmem>>, %arg12: memref<1x8x64xf32, #tpu.memory_space<vmem>>) attributes {dimension_semantics = [#tpu.dimension_semantics<parallel>], iteration_bounds = array<i64: 2>, scalar_prefetch = 0 : i64, scratch_operands = 0 : i64, tpu.core_type = #tpu.core_type<tc>, window_params = [{transform_indices = @transform_0, window_bounds = array<i64: 1, 4, 256>}, {pipeline_mode = #tpu.pipeline_mode<synchronous>, transform_indices = @transform_1, window_bounds = array<i64: 256, 64>}, {pipeline_mode = #tpu.pipeline_mode<synchronous>, transform_indices = @transform_2, window_bounds = array<i64: 9, 64>}, {pipeline_mode = #tpu.pipeline_mode<synchronous>, transform_indices = @transform_3, window_bounds = array<i64: 4, 9>}, {pipeline_mode = #tpu.pipeline_mode<synchronous>, transform_indices = @transform_4, window_bounds = array<i64: 4, 1>}, {pipeline_mode = #tpu.pipeline_mode<synchronous>, transform_indices = @transform_5, window_bounds = array<i64: 8, 4>}, {pipeline_mode = #tpu.pipeline_mode<synchronous>, transform_indices = @transform_6, window_bounds = array<i64: 8, 1>}, {pipeline_mode = #tpu.pipeline_mode<synchronous>, transform_indices = @transform_7, window_bounds = array<i64: 8, 9>}, {pipeline_mode = #tpu.pipeline_mode<synchronous>, transform_indices = @transform_8, window_bounds = array<i64: 8, 1>}, {pipeline_mode = #tpu.pipeline_mode<synchronous>, transform_indices = @transform_9, window_bounds = array<i64: 8, 8>}, {pipeline_mode = #tpu.pipeline_mode<synchronous>, transform_indices = @transform_10, window_bounds = array<i64: 8, 1>}, {transform_indices = @transform_11, window_bounds = array<i64: 1, 8, 64>}]} {
    %c0 = arith.constant 0 : index
    %c0_0 = arith.constant 0 : index
    %c0_1 = arith.constant 0 : index
    %0 = vector.load %arg1[%c0, %c0_0, %c0_1] : memref<1x4x256xf32, #tpu.memory_space<vmem>>, vector<1x4x256xf32>
    %1 = vector.shape_cast %0 : vector<1x4x256xf32> to vector<4x256xf32>
    %c255_i32 = arith.constant 255 : i32
    %2 = tpu.dynamic_rotate %1 by %c255_i32 dim 1 : vector<4x256xf32>, i32 -> vector<4x256xf32>
    %3 = arith.maximumf %1, %2 : vector<4x256xf32>
    %c240_i32 = arith.constant 240 : i32
    %4 = tpu.dynamic_rotate %3 by %c240_i32 dim 1 : vector<4x256xf32>, i32 -> vector<4x256xf32>
    %5 = arith.maximumf %3, %4 : vector<4x256xf32>
    %c0_2 = arith.constant 0 : index
    %c0_3 = arith.constant 0 : index
    %6 = vector.load %arg2[%c0_2, %c0_3] : memref<256x64xf32, #tpu.memory_space<vmem>>, vector<256x64xf32>
    %cst = arith.constant dense<0.000000e+00> : vector<4x64xf32>
    %7 = tpu.matmul %5, %6, %cst {dimension_numbers = #tpu.dot_dimension_numbers<[1], [0], [0], [1], [0, 0, 1, 1], [], []>} : vector<4x256xf32>, vector<256x64xf32>, vector<4x64xf32> -> vector<4x64xf32>
    %c0_4 = arith.constant 0 : index
    %c4 = arith.constant 4 : index
    %8 = vector.load %arg4[%c0_4, %c4] : memref<4x9xf32, #tpu.memory_space<vmem>>, vector<4x1xf32>
    %9 = vector.broadcast %8 : vector<4x1xf32> to vector<4x64xf32>
    %10 = arith.mulf %9, %7 : vector<4x64xf32>
    %c9_i32 = arith.constant 9 : i32
    %11 = tpu.dynamic_rotate %7 by %c9_i32 dim 1 : vector<4x64xf32>, i32 -> vector<4x64xf32>
    %c0_5 = arith.constant 0 : index
    %c0_6 = arith.constant 0 : index
    %12 = vector.load %arg3[%c0_5, %c0_6] : memref<9x64xf32, #tpu.memory_space<vmem>>, vector<1x64xf32>
    %13 = vector.shape_cast %12 : vector<1x64xf32> to vector<64xf32>
    %14 = vector.shape_cast %13 : vector<64xf32> to vector<1x64xf32>
    %15 = vector.broadcast %14 : vector<1x64xf32> to vector<4x64xf32>
    %16 = arith.mulf %11, %15 : vector<4x64xf32>
    %c0_7 = arith.constant 0 : index
    %c0_8 = arith.constant 0 : index
    %17 = vector.load %arg4[%c0_7, %c0_8] : memref<4x9xf32, #tpu.memory_space<vmem>>, vector<4x1xf32>
    %18 = vector.broadcast %17 : vector<4x1xf32> to vector<4x64xf32>
    %19 = arith.mulf %18, %16 : vector<4x64xf32>
    %20 = arith.addf %10, %19 : vector<4x64xf32>
    %c8_i32 = arith.constant 8 : i32
    %21 = tpu.dynamic_rotate %7 by %c8_i32 dim 1 : vector<4x64xf32>, i32 -> vector<4x64xf32>
    %c1 = arith.constant 1 : index
    %c0_9 = arith.constant 0 : index
    %22 = vector.load %arg3[%c1, %c0_9] : memref<9x64xf32, #tpu.memory_space<vmem>>, vector<1x64xf32>
    %23 = vector.shape_cast %22 : vector<1x64xf32> to vector<64xf32>
    %24 = vector.shape_cast %23 : vector<64xf32> to vector<1x64xf32>
    %25 = vector.broadcast %24 : vector<1x64xf32> to vector<4x64xf32>
    %26 = arith.mulf %21, %25 : vector<4x64xf32>
    %c0_10 = arith.constant 0 : index
    %c1_11 = arith.constant 1 : index
    %27 = vector.load %arg4[%c0_10, %c1_11] : memref<4x9xf32, #tpu.memory_space<vmem>>, vector<4x1xf32>
    %28 = vector.broadcast %27 : vector<4x1xf32> to vector<4x64xf32>
    %29 = arith.mulf %28, %26 : vector<4x64xf32>
    %30 = arith.addf %20, %29 : vector<4x64xf32>
    %c7_i32 = arith.constant 7 : i32
    %31 = tpu.dynamic_rotate %7 by %c7_i32 dim 1 : vector<4x64xf32>, i32 -> vector<4x64xf32>
    %c2 = arith.constant 2 : index
    %c0_12 = arith.constant 0 : index
    %32 = vector.load %arg3[%c2, %c0_12] : memref<9x64xf32, #tpu.memory_space<vmem>>, vector<1x64xf32>
    %33 = vector.shape_cast %32 : vector<1x64xf32> to vector<64xf32>
    %34 = vector.shape_cast %33 : vector<64xf32> to vector<1x64xf32>
    %35 = vector.broadcast %34 : vector<1x64xf32> to vector<4x64xf32>
    %36 = arith.mulf %31, %35 : vector<4x64xf32>
    %c0_13 = arith.constant 0 : index
    %c2_14 = arith.constant 2 : index
    %37 = vector.load %arg4[%c0_13, %c2_14] : memref<4x9xf32, #tpu.memory_space<vmem>>, vector<4x1xf32>
    %38 = vector.broadcast %37 : vector<4x1xf32> to vector<4x64xf32>
    %39 = arith.mulf %38, %36 : vector<4x64xf32>
    %40 = arith.addf %30, %39 : vector<4x64xf32>
    %c1_i32 = arith.constant 1 : i32
    %41 = tpu.dynamic_rotate %7 by %c1_i32 dim 1 : vector<4x64xf32>, i32 -> vector<4x64xf32>
    %c3 = arith.constant 3 : index
    %c0_15 = arith.constant 0 : index
    %42 = vector.load %arg3[%c3, %c0_15] : memref<9x64xf32, #tpu.memory_space<vmem>>, vector<1x64xf32>
    %43 = vector.shape_cast %42 : vector<1x64xf32> to vector<64xf32>
    %44 = vector.shape_cast %43 : vector<64xf32> to vector<1x64xf32>
    %45 = vector.broadcast %44 : vector<1x64xf32> to vector<4x64xf32>
    %46 = arith.mulf %41, %45 : vector<4x64xf32>
    %c0_16 = arith.constant 0 : index
    %c3_17 = arith.constant 3 : index
    %47 = vector.load %arg4[%c0_16, %c3_17] : memref<4x9xf32, #tpu.memory_space<vmem>>, vector<4x1xf32>
    %48 = vector.broadcast %47 : vector<4x1xf32> to vector<4x64xf32>
    %49 = arith.mulf %48, %46 : vector<4x64xf32>
    %50 = arith.addf %40, %49 : vector<4x64xf32>
    %c63_i32 = arith.constant 63 : i32
    %51 = tpu.dynamic_rotate %7 by %c63_i32 dim 1 : vector<4x64xf32>, i32 -> vector<4x64xf32>
    %c5 = arith.constant 5 : index
    %c0_18 = arith.constant 0 : index
    %52 = vector.load %arg3[%c5, %c0_18] : memref<9x64xf32, #tpu.memory_space<vmem>>, vector<1x64xf32>
    %53 = vector.shape_cast %52 : vector<1x64xf32> to vector<64xf32>
    %54 = vector.shape_cast %53 : vector<64xf32> to vector<1x64xf32>
    %55 = vector.broadcast %54 : vector<1x64xf32> to vector<4x64xf32>
    %56 = arith.mulf %51, %55 : vector<4x64xf32>
    %c0_19 = arith.constant 0 : index
    %c5_20 = arith.constant 5 : index
    %57 = vector.load %arg4[%c0_19, %c5_20] : memref<4x9xf32, #tpu.memory_space<vmem>>, vector<4x1xf32>
    %58 = vector.broadcast %57 : vector<4x1xf32> to vector<4x64xf32>
    %59 = arith.mulf %58, %56 : vector<4x64xf32>
    %60 = arith.addf %50, %59 : vector<4x64xf32>
    %c57_i32 = arith.constant 57 : i32
    %61 = tpu.dynamic_rotate %7 by %c57_i32 dim 1 : vector<4x64xf32>, i32 -> vector<4x64xf32>
    %c6 = arith.constant 6 : index
    %c0_21 = arith.constant 0 : index
    %62 = vector.load %arg3[%c6, %c0_21] : memref<9x64xf32, #tpu.memory_space<vmem>>, vector<1x64xf32>
    %63 = vector.shape_cast %62 : vector<1x64xf32> to vector<64xf32>
    %64 = vector.shape_cast %63 : vector<64xf32> to vector<1x64xf32>
    %65 = vector.broadcast %64 : vector<1x64xf32> to vector<4x64xf32>
    %66 = arith.mulf %61, %65 : vector<4x64xf32>
    %c0_22 = arith.constant 0 : index
    %c6_23 = arith.constant 6 : index
    %67 = vector.load %arg4[%c0_22, %c6_23] : memref<4x9xf32, #tpu.memory_space<vmem>>, vector<4x1xf32>
    %68 = vector.broadcast %67 : vector<4x1xf32> to vector<4x64xf32>
    %69 = arith.mulf %68, %66 : vector<4x64xf32>
    %70 = arith.addf %60, %69 : vector<4x64xf32>
    %c56_i32 = arith.constant 56 : i32
    %71 = tpu.dynamic_rotate %7 by %c56_i32 dim 1 : vector<4x64xf32>, i32 -> vector<4x64xf32>
    %c7 = arith.constant 7 : index
    %c0_24 = arith.constant 0 : index
    %72 = vector.load %arg3[%c7, %c0_24] : memref<9x64xf32, #tpu.memory_space<vmem>>, vector<1x64xf32>
    %73 = vector.shape_cast %72 : vector<1x64xf32> to vector<64xf32>
    %74 = vector.shape_cast %73 : vector<64xf32> to vector<1x64xf32>
    %75 = vector.broadcast %74 : vector<1x64xf32> to vector<4x64xf32>
    %76 = arith.mulf %71, %75 : vector<4x64xf32>
    %c0_25 = arith.constant 0 : index
    %c7_26 = arith.constant 7 : index
    %77 = vector.load %arg4[%c0_25, %c7_26] : memref<4x9xf32, #tpu.memory_space<vmem>>, vector<4x1xf32>
    %78 = vector.broadcast %77 : vector<4x1xf32> to vector<4x64xf32>
    %79 = arith.mulf %78, %76 : vector<4x64xf32>
    %80 = arith.addf %70, %79 : vector<4x64xf32>
    %c55_i32 = arith.constant 55 : i32
    %81 = tpu.dynamic_rotate %7 by %c55_i32 dim 1 : vector<4x64xf32>, i32 -> vector<4x64xf32>
    %c8 = arith.constant 8 : index
    %c0_27 = arith.constant 0 : index
    %82 = vector.load %arg3[%c8, %c0_27] : memref<9x64xf32, #tpu.memory_space<vmem>>, vector<1x64xf32>
    %83 = vector.shape_cast %82 : vector<1x64xf32> to vector<64xf32>
    %84 = vector.shape_cast %83 : vector<64xf32> to vector<1x64xf32>
    %85 = vector.broadcast %84 : vector<1x64xf32> to vector<4x64xf32>
    %86 = arith.mulf %81, %85 : vector<4x64xf32>
    %c0_28 = arith.constant 0 : index
    %c8_29 = arith.constant 8 : index
    %87 = vector.load %arg4[%c0_28, %c8_29] : memref<4x9xf32, #tpu.memory_space<vmem>>, vector<4x1xf32>
    %88 = vector.broadcast %87 : vector<4x1xf32> to vector<4x64xf32>
    %89 = arith.mulf %88, %86 : vector<4x64xf32>
    %90 = arith.addf %80, %89 : vector<4x64xf32>
    %c0_30 = arith.constant 0 : index
    %c0_31 = arith.constant 0 : index
    %91 = vector.load %arg5[%c0_30, %c0_31] : memref<4x1xf32, #tpu.memory_space<vmem>>, vector<4x1xf32>
    %92 = vector.broadcast %91 : vector<4x1xf32> to vector<4x64xf32>
    %93 = arith.addf %90, %92 : vector<4x64xf32>
    %c0_32 = arith.constant 0 : index
    %c0_33 = arith.constant 0 : index
    %94 = vector.load %arg6[%c0_32, %c0_33] : memref<8x4xf32, #tpu.memory_space<vmem>>, vector<8x4xf32>
    %cst_34 = arith.constant dense<0.000000e+00> : vector<8x64xf32>
    %95 = tpu.matmul %94, %93, %cst_34 {dimension_numbers = #tpu.dot_dimension_numbers<[1], [0], [0], [1], [0, 0, 1, 1], [], []>} : vector<8x4xf32>, vector<4x64xf32>, vector<8x64xf32> -> vector<8x64xf32>
    %c0_35 = arith.constant 0 : index
    %c0_36 = arith.constant 0 : index
    %96 = vector.load %arg7[%c0_35, %c0_36] : memref<8x1xf32, #tpu.memory_space<vmem>>, vector<8x1xf32>
    %97 = vector.broadcast %96 : vector<8x1xf32> to vector<8x64xf32>
    %98 = arith.addf %95, %97 : vector<8x64xf32>
    %cst_37 = arith.constant 0.000000e+00 : f32
    %99 = vector.broadcast %cst_37 : f32 to vector<8x64xf32>
    %100 = arith.maximumf %98, %99 : vector<8x64xf32>
    %c0_38 = arith.constant 0 : index
    %c4_39 = arith.constant 4 : index
    %101 = vector.load %arg8[%c0_38, %c4_39] : memref<8x9xf32, #tpu.memory_space<vmem>>, vector<8x1xf32>
    %102 = vector.broadcast %101 : vector<8x1xf32> to vector<8x64xf32>
    %103 = arith.mulf %102, %100 : vector<8x64xf32>
    %c9_i32_40 = arith.constant 9 : i32
    %104 = tpu.dynamic_rotate %100 by %c9_i32_40 dim 1 : vector<8x64xf32>, i32 -> vector<8x64xf32>
    %c0_41 = arith.constant 0 : index
    %c0_42 = arith.constant 0 : index
    %105 = vector.load %arg3[%c0_41, %c0_42] : memref<9x64xf32, #tpu.memory_space<vmem>>, vector<1x64xf32>
    %106 = vector.shape_cast %105 : vector<1x64xf32> to vector<64xf32>
    %107 = vector.shape_cast %106 : vector<64xf32> to vector<1x64xf32>
    %108 = vector.broadcast %107 : vector<1x64xf32> to vector<8x64xf32>
    %109 = arith.mulf %104, %108 : vector<8x64xf32>
    %c0_43 = arith.constant 0 : index
    %c0_44 = arith.constant 0 : index
    %110 = vector.load %arg8[%c0_43, %c0_44] : memref<8x9xf32, #tpu.memory_space<vmem>>, vector<8x1xf32>
    %111 = vector.broadcast %110 : vector<8x1xf32> to vector<8x64xf32>
    %112 = arith.mulf %111, %109 : vector<8x64xf32>
    %113 = arith.addf %103, %112 : vector<8x64xf32>
    %c8_i32_45 = arith.constant 8 : i32
    %114 = tpu.dynamic_rotate %100 by %c8_i32_45 dim 1 : vector<8x64xf32>, i32 -> vector<8x64xf32>
    %c1_46 = arith.constant 1 : index
    %c0_47 = arith.constant 0 : index
    %115 = vector.load %arg3[%c1_46, %c0_47] : memref<9x64xf32, #tpu.memory_space<vmem>>, vector<1x64xf32>
    %116 = vector.shape_cast %115 : vector<1x64xf32> to vector<64xf32>
    %117 = vector.shape_cast %116 : vector<64xf32> to vector<1x64xf32>
    %118 = vector.broadcast %117 : vector<1x64xf32> to vector<8x64xf32>
    %119 = arith.mulf %114, %118 : vector<8x64xf32>
    %c0_48 = arith.constant 0 : index
    %c1_49 = arith.constant 1 : index
    %120 = vector.load %arg8[%c0_48, %c1_49] : memref<8x9xf32, #tpu.memory_space<vmem>>, vector<8x1xf32>
    %121 = vector.broadcast %120 : vector<8x1xf32> to vector<8x64xf32>
    %122 = arith.mulf %121, %119 : vector<8x64xf32>
    %123 = arith.addf %113, %122 : vector<8x64xf32>
    %c7_i32_50 = arith.constant 7 : i32
    %124 = tpu.dynamic_rotate %100 by %c7_i32_50 dim 1 : vector<8x64xf32>, i32 -> vector<8x64xf32>
    %c2_51 = arith.constant 2 : index
    %c0_52 = arith.constant 0 : index
    %125 = vector.load %arg3[%c2_51, %c0_52] : memref<9x64xf32, #tpu.memory_space<vmem>>, vector<1x64xf32>
    %126 = vector.shape_cast %125 : vector<1x64xf32> to vector<64xf32>
    %127 = vector.shape_cast %126 : vector<64xf32> to vector<1x64xf32>
    %128 = vector.broadcast %127 : vector<1x64xf32> to vector<8x64xf32>
    %129 = arith.mulf %124, %128 : vector<8x64xf32>
    %c0_53 = arith.constant 0 : index
    %c2_54 = arith.constant 2 : index
    %130 = vector.load %arg8[%c0_53, %c2_54] : memref<8x9xf32, #tpu.memory_space<vmem>>, vector<8x1xf32>
    %131 = vector.broadcast %130 : vector<8x1xf32> to vector<8x64xf32>
    %132 = arith.mulf %131, %129 : vector<8x64xf32>
    %133 = arith.addf %123, %132 : vector<8x64xf32>
    %c1_i32_55 = arith.constant 1 : i32
    %134 = tpu.dynamic_rotate %100 by %c1_i32_55 dim 1 : vector<8x64xf32>, i32 -> vector<8x64xf32>
    %c3_56 = arith.constant 3 : index
    %c0_57 = arith.constant 0 : index
    %135 = vector.load %arg3[%c3_56, %c0_57] : memref<9x64xf32, #tpu.memory_space<vmem>>, vector<1x64xf32>
    %136 = vector.shape_cast %135 : vector<1x64xf32> to vector<64xf32>
    %137 = vector.shape_cast %136 : vector<64xf32> to vector<1x64xf32>
    %138 = vector.broadcast %137 : vector<1x64xf32> to vector<8x64xf32>
    %139 = arith.mulf %134, %138 : vector<8x64xf32>
    %c0_58 = arith.constant 0 : index
    %c3_59 = arith.constant 3 : index
    %140 = vector.load %arg8[%c0_58, %c3_59] : memref<8x9xf32, #tpu.memory_space<vmem>>, vector<8x1xf32>
    %141 = vector.broadcast %140 : vector<8x1xf32> to vector<8x64xf32>
    %142 = arith.mulf %141, %139 : vector<8x64xf32>
    %143 = arith.addf %133, %142 : vector<8x64xf32>
    %c63_i32_60 = arith.constant 63 : i32
    %144 = tpu.dynamic_rotate %100 by %c63_i32_60 dim 1 : vector<8x64xf32>, i32 -> vector<8x64xf32>
    %c5_61 = arith.constant 5 : index
    %c0_62 = arith.constant 0 : index
    %145 = vector.load %arg3[%c5_61, %c0_62] : memref<9x64xf32, #tpu.memory_space<vmem>>, vector<1x64xf32>
    %146 = vector.shape_cast %145 : vector<1x64xf32> to vector<64xf32>
    %147 = vector.shape_cast %146 : vector<64xf32> to vector<1x64xf32>
    %148 = vector.broadcast %147 : vector<1x64xf32> to vector<8x64xf32>
    %149 = arith.mulf %144, %148 : vector<8x64xf32>
    %c0_63 = arith.constant 0 : index
    %c5_64 = arith.constant 5 : index
    %150 = vector.load %arg8[%c0_63, %c5_64] : memref<8x9xf32, #tpu.memory_space<vmem>>, vector<8x1xf32>
    %151 = vector.broadcast %150 : vector<8x1xf32> to vector<8x64xf32>
    %152 = arith.mulf %151, %149 : vector<8x64xf32>
    %153 = arith.addf %143, %152 : vector<8x64xf32>
    %c57_i32_65 = arith.constant 57 : i32
    %154 = tpu.dynamic_rotate %100 by %c57_i32_65 dim 1 : vector<8x64xf32>, i32 -> vector<8x64xf32>
    %c6_66 = arith.constant 6 : index
    %c0_67 = arith.constant 0 : index
    %155 = vector.load %arg3[%c6_66, %c0_67] : memref<9x64xf32, #tpu.memory_space<vmem>>, vector<1x64xf32>
    %156 = vector.shape_cast %155 : vector<1x64xf32> to vector<64xf32>
    %157 = vector.shape_cast %156 : vector<64xf32> to vector<1x64xf32>
    %158 = vector.broadcast %157 : vector<1x64xf32> to vector<8x64xf32>
    %159 = arith.mulf %154, %158 : vector<8x64xf32>
    %c0_68 = arith.constant 0 : index
    %c6_69 = arith.constant 6 : index
    %160 = vector.load %arg8[%c0_68, %c6_69] : memref<8x9xf32, #tpu.memory_space<vmem>>, vector<8x1xf32>
    %161 = vector.broadcast %160 : vector<8x1xf32> to vector<8x64xf32>
    %162 = arith.mulf %161, %159 : vector<8x64xf32>
    %163 = arith.addf %153, %162 : vector<8x64xf32>
    %c56_i32_70 = arith.constant 56 : i32
    %164 = tpu.dynamic_rotate %100 by %c56_i32_70 dim 1 : vector<8x64xf32>, i32 -> vector<8x64xf32>
    %c7_71 = arith.constant 7 : index
    %c0_72 = arith.constant 0 : index
    %165 = vector.load %arg3[%c7_71, %c0_72] : memref<9x64xf32, #tpu.memory_space<vmem>>, vector<1x64xf32>
    %166 = vector.shape_cast %165 : vector<1x64xf32> to vector<64xf32>
    %167 = vector.shape_cast %166 : vector<64xf32> to vector<1x64xf32>
    %168 = vector.broadcast %167 : vector<1x64xf32> to vector<8x64xf32>
    %169 = arith.mulf %164, %168 : vector<8x64xf32>
    %c0_73 = arith.constant 0 : index
    %c7_74 = arith.constant 7 : index
    %170 = vector.load %arg8[%c0_73, %c7_74] : memref<8x9xf32, #tpu.memory_space<vmem>>, vector<8x1xf32>
    %171 = vector.broadcast %170 : vector<8x1xf32> to vector<8x64xf32>
    %172 = arith.mulf %171, %169 : vector<8x64xf32>
    %173 = arith.addf %163, %172 : vector<8x64xf32>
    %c55_i32_75 = arith.constant 55 : i32
    %174 = tpu.dynamic_rotate %100 by %c55_i32_75 dim 1 : vector<8x64xf32>, i32 -> vector<8x64xf32>
    %c8_76 = arith.constant 8 : index
    %c0_77 = arith.constant 0 : index
    %175 = vector.load %arg3[%c8_76, %c0_77] : memref<9x64xf32, #tpu.memory_space<vmem>>, vector<1x64xf32>
    %176 = vector.shape_cast %175 : vector<1x64xf32> to vector<64xf32>
    %177 = vector.shape_cast %176 : vector<64xf32> to vector<1x64xf32>
    %178 = vector.broadcast %177 : vector<1x64xf32> to vector<8x64xf32>
    %179 = arith.mulf %174, %178 : vector<8x64xf32>
    %c0_78 = arith.constant 0 : index
    %c8_79 = arith.constant 8 : index
    %180 = vector.load %arg8[%c0_78, %c8_79] : memref<8x9xf32, #tpu.memory_space<vmem>>, vector<8x1xf32>
    %181 = vector.broadcast %180 : vector<8x1xf32> to vector<8x64xf32>
    %182 = arith.mulf %181, %179 : vector<8x64xf32>
    %183 = arith.addf %173, %182 : vector<8x64xf32>
    %c0_80 = arith.constant 0 : index
    %c0_81 = arith.constant 0 : index
    %184 = vector.load %arg9[%c0_80, %c0_81] : memref<8x1xf32, #tpu.memory_space<vmem>>, vector<8x1xf32>
    %185 = vector.broadcast %184 : vector<8x1xf32> to vector<8x64xf32>
    %186 = arith.addf %183, %185 : vector<8x64xf32>
    %c0_82 = arith.constant 0 : index
    %c0_83 = arith.constant 0 : index
    %187 = vector.load %arg10[%c0_82, %c0_83] : memref<8x8xf32, #tpu.memory_space<vmem>>, vector<8x8xf32>
    %cst_84 = arith.constant dense<0.000000e+00> : vector<8x64xf32>
    %188 = tpu.matmul %187, %186, %cst_84 {dimension_numbers = #tpu.dot_dimension_numbers<[1], [0], [0], [1], [0, 0, 1, 1], [], []>} : vector<8x8xf32>, vector<8x64xf32>, vector<8x64xf32> -> vector<8x64xf32>
    %c0_85 = arith.constant 0 : index
    %c0_86 = arith.constant 0 : index
    %189 = vector.load %arg11[%c0_85, %c0_86] : memref<8x1xf32, #tpu.memory_space<vmem>>, vector<8x1xf32>
    %190 = vector.broadcast %189 : vector<8x1xf32> to vector<8x64xf32>
    %191 = arith.addf %188, %190 : vector<8x64xf32>
    %cst_87 = arith.constant 0.000000e+00 : f32
    %192 = vector.broadcast %cst_87 : f32 to vector<8x64xf32>
    %193 = arith.maximumf %191, %192 : vector<8x64xf32>
    %c0_88 = arith.constant 0 : index
    %c0_89 = arith.constant 0 : index
    %c0_90 = arith.constant 0 : index
    %194 = vector.load %arg12[%c0_88, %c0_89, %c0_90] : memref<1x8x64xf32, #tpu.memory_space<vmem>>, vector<1x8x64xf32>
    %195 = vector.shape_cast %194 : vector<1x8x64xf32> to vector<8x64xf32>
    %196 = vector.shape_cast %193 : vector<8x64xf32> to vector<1x8x64xf32>
    tpu.vector_store %arg12[%c0_88, %c0_89, %c0_90], %196 {strides = array<i32>} : memref<1x8x64xf32, #tpu.memory_space<vmem>>, vector<1x8x64xf32>,
    return
  }
  func.func @transform_0(%arg0: i32) -> (i32, i32, i32) {
    %c0_i32 = arith.constant 0 : i32
    %c0_i32_0 = arith.constant 0 : i32
    %c0_i32_1 = arith.constant 0 : i32
    return %arg0, %c0_i32, %c0_i32_0 : i32, i32, i32
  }
  func.func @transform_1(%arg0: i32) -> (i32, i32) {
    %c0_i32 = arith.constant 0 : i32
    %c0_i32_0 = arith.constant 0 : i32
    %c0_i32_1 = arith.constant 0 : i32
    return %c0_i32, %c0_i32_0 : i32, i32
  }
  func.func @transform_2(%arg0: i32) -> (i32, i32) {
    %c0_i32 = arith.constant 0 : i32
    %c0_i32_0 = arith.constant 0 : i32
    %c0_i32_1 = arith.constant 0 : i32
    return %c0_i32, %c0_i32_0 : i32, i32
  }
  func.func @transform_3(%arg0: i32) -> (i32, i32) {
    %c0_i32 = arith.constant 0 : i32
    %c0_i32_0 = arith.constant 0 : i32
    %c0_i32_1 = arith.constant 0 : i32
    return %c0_i32, %c0_i32_0 : i32, i32
  }
  func.func @transform_4(%arg0: i32) -> (i32, i32) {
    %c0_i32 = arith.constant 0 : i32
    %c0_i32_0 = arith.constant 0 : i32
    %c0_i32_1 = arith.constant 0 : i32
    return %c0_i32, %c0_i32_0 : i32, i32
  }
  func.func @transform_5(%arg0: i32) -> (i32, i32) {
    %c0_i32 = arith.constant 0 : i32
    %c0_i32_0 = arith.constant 0 : i32
    %c0_i32_1 = arith.constant 0 : i32
    return %c0_i32, %c0_i32_0 : i32, i32
  }
  func.func @transform_6(%arg0: i32) -> (i32, i32) {
    %c0_i32 = arith.constant 0 : i32
    %c0_i32_0 = arith.constant 0 : i32
    %c0_i32_1 = arith.constant 0 : i32
    return %c0_i32, %c0_i32_0 : i32, i32
  }
  func.func @transform_7(%arg0: i32) -> (i32, i32) {
    %c0_i32 = arith.constant 0 : i32
    %c0_i32_0 = arith.constant 0 : i32
    %c0_i32_1 = arith.constant 0 : i32
    return %c0_i32, %c0_i32_0 : i32, i32
  }
  func.func @transform_8(%arg0: i32) -> (i32, i32) {
    %c0_i32 = arith.constant 0 : i32
    %c0_i32_0 = arith.constant 0 : i32
    %c0_i32_1 = arith.constant 0 : i32
    return %c0_i32, %c0_i32_0 : i32, i32
  }
  func.func @transform_9(%arg0: i32) -> (i32, i32) {
    %c0_i32 = arith.constant 0 : i32
    %c0_i32_0 = arith.constant 0 : i32
    %c0_i32_1 = arith.constant 0 : i32
    return %c0_i32, %c0_i32_0 : i32, i32
  }
  func.func @transform_10(%arg0: i32) -> (i32, i32) {
    %c0_i32 = arith.constant 0 : i32
    %c0_i32_0 = arith.constant 0 : i32
    %c0_i32_1 = arith.constant 0 : i32
    return %c0_i32, %c0_i32_0 : i32, i32
  }
  func.func @transform_11(%arg0: i32) -> (i32, i32, i32) {
    %c0_i32 = arith.constant 0 : i32
    %c0_i32_0 = arith.constant 0 : i32
    %c0_i32_1 = arith.constant 0 : i32
    return %arg0, %c0_i32, %c0_i32_0 : i32, i32, i32
  }
}

</mosaic_0001>

<bundles_post_ra>
// kernel: down_ds_forward.1
= control target key start
LH: loop header
LB: loop body
LE: loop exit
PB: predicated region body
PF: predicated region fallthrough
CT: control target
= control target key end

     0   :  { %s1292_s17 = smov 0   ;;  %s1550_s0 = inlined_call_operand.vmem [shape: f32[2,4,256], index: 0, kind: input, shape index: {}]   ;;  %s1551_s1 = inlined_call_operand.vmem [shape: f32[256,64], index: 1, kind: input, shape index: {}]   ;;  %s1552_s2 = inlined_call_operand.vmem [shape: f32[9,64], index: 2, kind: input, shape index: {}]   ;;  %s1553_s3 = inlined_call_operand.vmem [shape: f32[4,9], index: 3, kind: input, shape index: {}]   ;;  %s1554_s4 = inlined_call_operand.vmem [shape: f32[4,1], index: 4, kind: input, shape index: {}]   ;;  %s1555_s5 = inlined_call_operand.vmem [shape: f32[8,4], index: 5, kind: input, shape index: {}]   ;;  %s1556_s6 = inlined_call_operand.vmem [shape: f32[8,1], index: 6, kind: input, shape index: {}]   ;;  %s1557_s7 = inlined_call_operand.vmem [shape: f32[8,9], index: 7, kind: input, shape index: {}]   ;;  %s1558_s8 = inlined_call_operand.vmem [shape: f32[8,1], index: 8, kind: input, shape index: {}]   ;;  %s1559_s9 = inlined_call_operand.vmem [shape: f32[8,8], index: 9, kind: input, shape index: {}]   ;;  %s1560_s10 = inlined_call_operand.vmem [shape: f32[8,1], index: 10, kind: input, shape index: {}]   ;;  %s1561_s11 = inlined_call_operand.vmem [shape: f32[2,8,64], index: 11, kind: output, shape index: {}]  }
   0x1 LB: > { %s1035_s18 = sadd.s32 4294967295, %s1201_s17   ;;  %p1039_p0 = scmp.ge.s32.totalorder %s1201_s17, 1  ;;  %s1201_s17 = sphi %s1292_s17, %s21_s17  }
   0x2   : > { %p337_p1 = scmp.lt.s32.totalorder %s1201_s17, 3 }
   0x4   : > { %p338_p2 = pnand %p1039_p0, %p337_p1 }
   0x5   : > { %p376_p3 = scmp.lt.s32.totalorder (!%p338_p2), %s1035_s18, 1  ;;  %s1203_s23 = smov (!%p338_p2), 127   ;;  %v434_v2 = vld [vmem:[%s1551_s1 + $0x80] sm:$0xff] (!%p338_p2)  ;;  %v435_v3 = vld [vmem:[%s1551_s1 + $0x88] sm:$0xff] (!%p338_p2)  ;;  %v436_v7 = vld [vmem:[%s1551_s1 + $0x90] sm:$0xff] (!%p338_p2)  ;;  %v393_v32 = vlaneseq (!%p338_p2)  ;;  %vm530_vm2 = vcmask (!%p338_p2), 1048064  }
   0x6   : > { %341 = sbr.rel (%p338_p2) target bundleno = 1691 (0x69b), region = 64  ;;  %v418_v4 = vld [vmem:[%s1551_s1] sm:$0xff] (!%p338_p2)  ;;  %v1106_v5 = vpack.c.bf16 (!%p338_p2), %v435_v3, %v434_v2  ;;  %v419_v6 = vld [vmem:[%s1551_s1 + $0x8] sm:$0xff] (!%p338_p2)  ;;  %v437_v8 = vld [vmem:[%s1551_s1 + $0x98] sm:$0xff] (!%p338_p2)  ;;  %s1204_s28 = smov (!%p338_p2), 112   ;;  %v1205_v3 = vmov (!%p338_p2), 1  }
   0x7   : > { %v1108_v9 = vpack.c.bf16 (!%p338_p2), %v419_v6, %v418_v4  ;;  %v1110_v10 = vpack.c.bf16 (!%p338_p2), %v437_v8, %v436_v7  ;;  %v420_v11 = vld [vmem:[%s1551_s1 + $0x10] sm:$0xff] (!%p338_p2)  ;;  %v421_v12 = vld [vmem:[%s1551_s1 + $0x18] sm:$0xff] (!%p338_p2)  ;;  %v438_v13 = vld [vmem:[%s1551_s1 + $0xa0] sm:$0xff] (!%p338_p2)  ;;  %v394_v39 = vand.u32 (!%p338_p2), 127, %v393_v32  ;;  %1176 = vset.pattern.permute.xlu0 (!%p338_p2), %v1205_v3  ;;  %v1206_v4 = vmov (!%p338_p2), 0   ;;  %s1211_s12 = smov (!%p338_p2), 64  }
   0x8   : > { %1107 = vmatprep.subr.bf16.mxu0 (!%p338_p2), %v1106_v5  ;;  %v439_v14 = vld [vmem:[%s1551_s1 + $0xa8] sm:$0xff] (!%p338_p2)  ;;  %v1112_v15 = vpack.c.bf16 (!%p338_p2), %v421_v12, %v420_v11  ;;  %v422_v17 = vld [vmem:[%s1551_s1 + $0x20] sm:$0xff] (!%p338_p2)  ;;  %v440_v19 = vld [vmem:[%s1551_s1 + $0xb0] sm:$0xff] (!%p338_p2)  ;;  %1175 = vset.pattern.permute.xlu1 (!%p338_p2), %v1206_v4  ;;  %v1207_v5 = vmov (!%p338_p2), 2   ;;  %v1208_v6 = vmov (!%p338_p2), 3   ;;  %v1209_v7 = vmov (!%p338_p2), 5  }
   0x9   : > { %1109 = vmatpush3.bf16.msra.mxu0 (!%p338_p2), %v1108_v9  ;;  %v1114_v16 = vpack.c.bf16 (!%p338_p2), %v439_v14, %v438_v13  ;;  %v423_v18 = vld [vmem:[%s1551_s1 + $0x28] sm:$0xff] (!%p338_p2)  ;;  %v441_v20 = vld [vmem:[%s1551_s1 + $0xb8] sm:$0xff] (!%p338_p2)  ;;  %v424_v23 = vld [vmem:[%s1551_s1 + $0x30] sm:$0xff] (!%p338_p2)  ;;  %vm395_vm0 = vcmp.lt.s32.totalorder (!%p338_p2), %v394_v39, 127  ;;  %vm410_vm1 = vcmp.lt.s32.totalorder (!%p338_p2), %v394_v39, 112  ;;  %v1210_v8 = vmov (!%p338_p2), 6  }
   0xa   : > { %1111 = vmatprep.subr.bf16.mxu0 (!%p338_p2), %v1110_v10  ;;  %v1116_v21 = vpack.c.bf16 (!%p338_p2), %v423_v18, %v422_v17  ;;  %v1118_v22 = vpack.c.bf16 (!%p338_p2), %v441_v20, %v440_v19  ;;  %v425_v24 = vld [vmem:[%s1551_s1 + $0x38] sm:$0xff] (!%p338_p2)  ;;  %v442_v25 = vld [vmem:[%s1551_s1 + $0xc0] sm:$0xff] (!%p338_p2)  ;;  %v443_v26 = vld [vmem:[%s1551_s1 + $0xc8] sm:$0xff] (!%p338_p2)  ;;  %s1212_s15 = smov (!%p338_p2), 55   ;;  %s1213_s21 = smov (!%p338_p2), 56   ;;  %vm1230_vm3 = vmmov (!%p338_p2), 0  }
   0xb   : > { %v1120_v27 = vpack.c.bf16 (!%p338_p2), %v425_v24, %v424_v23  ;;  %v1122_v28 = vpack.c.bf16 (!%p338_p2), %v443_v26, %v442_v25  ;;  %v426_v29 = vld [vmem:[%s1551_s1 + $0x40] sm:$0xff] (!%p338_p2)  ;;  %v427_v30 = vld [vmem:[%s1551_s1 + $0x48] sm:$0xff] (!%p338_p2)  ;;  %v444_v33 = vld [vmem:[%s1551_s1 + $0xd0] sm:$0xff] (!%p338_p2)  ;;  %s1214_s25 = smov (!%p338_p2), 57   ;;  %s1216_s13 = smov (!%p338_p2), 1   ;;  %v1222_v24 = vmov (!%p338_p2), 4  }
   0xc   : > { %v1124_v31 = vpack.c.bf16 (!%p338_p2), %v427_v30, %v426_v29  ;;  %v445_v34 = vld [vmem:[%s1551_s1 + $0xd8] sm:$0xff] (!%p338_p2)  ;;  %v428_v36 = vld [vmem:[%s1551_s1 + $0x50] sm:$0xff] (!%p338_p2)  ;;  %v446_v40 = vld [vmem:[%s1551_s1 + $0xe0] sm:$0xff] (!%p338_p2)  ;;  %s1217_s16 = smov (!%p338_p2), 7   ;;  %s1221_s26 = smov (!%p338_p2), 8   ;;  %vm715_vm4 = vcmask (!%p338_p2), 1043456  }
   0xd   : > { %s1563_s18 = smov (!%p376_p3, %s1035_s18), 1  ;;  %1113 = vmatpush3.bf16.msra.mxu0 %v1112_v15  ;;  %v1126_v35 = vpack.c.bf16 %v445_v34, %v444_v33  ;;  %v429_v37 = vld [vmem:[%s1551_s1 + $0x58] sm:$0xff]  ;;  %v447_v41 = vld [vmem:[%s1551_s1 + $0xe8] sm:$0xff]  ;;  %v430_v43 = vld [vmem:[%s1551_s1 + $0x60] sm:$0xff]  ;;  %s1223_s27 = smov 72   ;;  %vm711_vm5 = vcmask 31744  }
   0xe   : > { %s1056_s19 = sshll.u32 %s1563_s18, 3  ;;  %1115 = vmatprep.subr.bf16.mxu0 %v1114_v16  ;;  %v1128_v38 = vpack.c.bf16 %v429_v37, %v428_v36  ;;  %v1130_v42 = vpack.c.bf16 %v447_v41, %v446_v40  ;;  %v431_v44 = vld [vmem:[%s1551_s1 + $0x68] sm:$0xff]  ;;  %v448_v47 = vld [vmem:[%s1551_s1 + $0xf0] sm:$0xff]  ;;  %v449_v48 = vld [vmem:[%s1551_s1 + $0xf8] sm:$0xff]  ;;  %s1225_s29 = smov 65   ;;  %vm905_vm6 = vcmask 64512  }
   0xf   : > { %s380_s22 = scalar_lea.vmem %s1550_s0, %s1056_s19  ;;  %v1132_v46 = vpack.c.bf16 %v431_v44, %v430_v43  ;;  %v432_v49 = vld [vmem:[%s1551_s1 + $0x70] sm:$0xff]  ;;  %v1134_v50 = vpack.c.bf16 %v449_v48, %v448_v47  ;;  %v433_v51 = vld [vmem:[%s1551_s1 + $0x78] sm:$0xff]  ;;  %v1043_v12 = vld [vmem:[%s1552_s2] ss:$0 sm:$0xff]  ;;  %s1226_s30 = smov 71   ;;  %vm980_vm7 = vcmask 523264  }
  0x10   : > { %v1308_v0 = vld [vmem:[%s380_s22] sm:$0xff]  ;;  %v1136_v53 = vpack.c.bf16 %v433_v51, %v432_v49  ;;  %v1050_v18 = vld [vmem:[%s1552_s2 + $0x8] ss:$0 sm:$0xff]  ;;  %s1218_s22 = smov 9   ;;  %s1231_s20 = smov 120  }
  0x11   : > { %389 = vrot.lane.b32.xlu0 %v1308_v0, %s1203_s23  ;;  %v387_v1 = vcombine.high %v1308_v0, %v1308_v0  ;;  %1117 = vmatpush3.bf16.msra.mxu0 %v1116_v21  ;;  %v1044_v13 = vld [vmem:[%s1552_s2 + $0x1] ss:$0 sm:$0xff]  ;;  %v1045_v14 = vld [vmem:[%s1552_s2 + $0x2] ss:$0 sm:$0xff]  ;;  %v1046_v15 = vld [vmem:[%s1552_s2 + $0x3] ss:$0 sm:$0xff] }
  0x12   : > { %1119 = vmatprep.subr.bf16.mxu0 %v1118_v22  ;;  %v1047_v16 = vld [vmem:[%s1552_s2 + $0x5] ss:$0 sm:$0xff]  ;;  %v1048_v17 = vld [vmem:[%s1552_s2 + $0x6] ss:$0 sm:$0xff]  ;;  %v1219_v21 = vmov 7   ;;  %v1220_v22 = vmov 8  }
  0x13   : > { %v1049_v23 = vld [vmem:[%s1552_s2 + $0x7] ss:$0 sm:$0xff] }
  0x15   : > { %391 = vrot.lane.b32.xlu0 %v387_v1, %s1203_s23  ;;  %1121 = vmatpush3.bf16.msra.mxu0 %v1120_v27 }
  0x16   : > { %1123 = vmatprep.subr.bf16.mxu0 %v1122_v28 }
  0x19   : > { %1125 = vmatpush3.bf16.msra.mxu0 %v1124_v31 }
  0x1a   : > { %1127 = vmatprep.subr.bf16.mxu0 %v1126_v35 }
  0x1d   : > { %1129 = vmatpush3.bf16.msra.mxu0 %v1128_v38 }
  0x1e   : > { %1131 = vmatprep.subr.bf16.mxu0 %v1130_v42 }
  0x21   : > { %1133 = vmatpush3.bf16.msra.mxu0 %v1132_v46  ;;  %v697_v46 = vld [vmem:[%s1554_s4] sm:$0xf] }
  0x22   : > { %1135 = vmatprep.subr.bf16.mxu0 %v1134_v50 }
  0x25   : > { %1137 = vmatpush3.bf16.msra.mxu0 %v1136_v53 }
  0x83   : > { %v390_v45 = vpop.permute.xlu0 %389 }
  0x87   : > { %v392_v52 = vpop.permute.xlu0 %391 }
  0x88   : > { %v396_v54 = vsel %vm395_vm0, %v390_v45, %v392_v52  ;;  %v397_v55 = vsel %vm395_vm0, %v392_v52, %v390_v45 }
  0x89   : > { %v400_v56 = vcombine.low %v396_v54, %v397_v55  ;;  %v1228_v55 = vmov 0.0  }
  0x8a   : > { %1096 = vmatprep.subr.mxu1 %v1228_v55  ;;  %1098 = vmatprep.mubr.msk.f32.mxu1 %vm1230_vm3, %v1228_v55 }
  0x8b   : > { %v402_v57 = vmax.f32 %v1308_v0, %v400_v56  ;;  %v523_v0 = vld [vmem:[%s1553_s3] sm:$0xf] }
  0x8d   : > { %406 = vrot.lane.b32.xlu1 %v402_v57, %s1204_s28  ;;  %v404_v58 = vcombine.high %v402_v57, %v402_v57 }
  0x91   : > { %408 = vrot.lane.b32.xlu1 %v404_v58, %s1204_s28  ;;  %s1215_s28 = smov 63  }
  0x95   : > { %548 = vperm.xlu1 %1175, %v523_v0  }
  0x99   : > { %1177 = vset.pattern.permute.xlu1 %v1207_v5 }
  0x9a   : > { %588 = vperm.xlu1 %1177, %v523_v0  }
  0x9e   : > { %1178 = vset.pattern.permute.xlu1 %v1208_v6 }
  0x9f   : > { %608 = vperm.xlu1 %1178, %v523_v0  }
  0xa3   : > { %1179 = vset.pattern.permute.xlu1 %v1209_v7 }
  0xa4   : > { %628 = vperm.xlu1 %1179, %v523_v0  }
  0xa8   : > { %1180 = vset.pattern.permute.xlu1 %v1210_v8 }
  0xff   : > { %v407_v59 = vpop.permute.xlu1 %406 }
 0x103   : > { %v409_v60 = vpop.permute.xlu1 %408 }
 0x104   : > { %v411_v61 = vsel %vm410_vm1, %v407_v59, %v409_v60  ;;  %v412_v62 = vsel %vm410_vm1, %v409_v60, %v407_v59 }
 0x105   : > { %v415_v63 = vcombine.low %v411_v61, %v412_v62  ;;  %v705_v61 = vld [vmem:[%s1556_s6] sm:$0xff] }
 0x106   : > { %v790_v62 = vld [vmem:[%s1557_s7] sm:$0xff] }
 0x107   : > { %v417_v1 = vmax.f32 %v402_v57, %v415_v63 }
 0x109   : > { %v451_v2 = vcombine.high %v417_v1, %v417_v1 }
 0x10b   : > { %517 = vmatprep.mubr.f32.mxu0 %v451_v2 }
 0x10c   : > { %518 = vmatmul.mubr.f32.vlgmr.msra.gmra.mrb[0].mxu0 %v417_v1 }
 0x114   : > { %v549_v25 = vpop.permute.xlu1 %548 }
 0x119   : > { %v589_v27 = vpop.permute.xlu1 %588 }
 0x11e   : > { %v609_v29 = vpop.permute.xlu1 %608 }
 0x123   : > { %v629_v31 = vpop.permute.xlu1 %628 }
 0x1df   : > { %v1089_v9 = vpop.f32.mrb[0].mxu0 }
 0x1e0   : > { %v1090_v10 = vpop.f32.mrb[1].mxu0 }
 0x1e1   : > { %v1420_v11 = vadd.f32 %v1090_v10, %v1089_v9 }
 0x1e3   : > { %531 = vrot.lane.b32.xlu0 %v1420_v11, %s1211_s12 }
 0x1e7   : > { %568 = vperm.xlu0 %1176, %v523_v0  }
 0x1eb   : > { %543 = vrot.lane.b32.xlu0 %v1043_v12, %s1212_s15  ;;  %s1227_s15 = smov 121  }
 0x1ef   : > { %563 = vrot.lane.b32.xlu0 %v1044_v13, %s1213_s21 }
 0x1f3   : > { %583 = vrot.lane.b32.xlu0 %v1045_v14, %s1214_s25 }
 0x1f7   : > { %603 = vrot.lane.b32.xlu0 %v1046_v15, %s1215_s28  ;;  %s1224_s28 = smov 73  }
 0x1fb   : > { %623 = vrot.lane.b32.xlu0 %v1047_v16, %s1216_s13 }
 0x1ff   : > { %643 = vrot.lane.b32.xlu0 %v1048_v17, %s1217_s16  ;;  %s1229_s16 = smov 119  }
 0x203   : > { %683 = vrot.lane.b32.xlu0 %v1050_v18, %s1218_s22 }
 0x255   : > { %v532_v19 = vpop.permute.xlu0 %531 }
 0x256   : > { %v533_v20 = vsel %vm530_vm2, %v532_v19, %v1420_v11 }
 0x257   : > { %534 = vrot.lane.b32.xlu1 %v533_v20, %s1211_s12 }
 0x25b   : > { %648 = vperm.xlu1 %1180, %v523_v0  }
 0x25f   : > { %1181 = vset.pattern.permute.xlu1 %v1219_v21 }
 0x260   : > { %668 = vperm.xlu1 %1181, %v523_v0  }
 0x264   : > { %1182 = vset.pattern.permute.xlu1 %v1220_v22 }
 0x265   : > { %688 = vperm.xlu1 %1182, %v523_v0  }
 0x266   : > { %v569_v26 = vpop.permute.xlu0 %568 }
 0x269   : > { %663 = vrot.lane.b32.xlu1 %v1049_v23, %s1221_s26 }
 0x26a   : > { %1183 = vset.pattern.permute.xlu1 %v1222_v24  ;;  %v1455_v28 = vpop.permute.xlu0 %543 }
 0x26d   : > { %526 = vperm.xlu1 %1183, %v523_v0  }
 0x26e   : > { %v1457_v30 = vpop.permute.xlu0 %563 }
 0x271   : > { %1184 = vset.pattern.permute.xlu1 %v1206_v4 }
 0x272   : > { %v1459_v32 = vpop.permute.xlu0 %583 }
 0x276   : > { %v1461_v34 = vpop.permute.xlu0 %603 }
 0x27a   : > { %v1471_v42 = vpop.permute.xlu0 %623 }
 0x27e   : > { %v1480_v48 = vpop.permute.xlu0 %643 }
 0x282   : > { %v1484_v53 = vpop.permute.xlu0 %683 }
 0x2c9   : > { %v535_v33 = vpop.permute.xlu1 %534 }
 0x2ca   : > { %v536_v35 = vsel %vm530_vm2, %v535_v33, %v1420_v11 }
 0x2cb   : > { %v566_v36 = vmul.f32 %v1457_v30, %v536_v35  ;;  %v546_v37 = vmul.f32 %v1455_v28, %v536_v35  ;;  %v606_v40 = vmul.f32 %v1461_v34, %v536_v35  ;;  %v586_v41 = vmul.f32 %v1459_v32, %v536_v35 }
 0x2cc   : > { %v626_v45 = vmul.f32 %v1471_v42, %v536_v35  ;;  %v646_v49 = vmul.f32 %v1480_v48, %v536_v35  ;;  %v686_v54 = vmul.f32 %v1484_v53, %v536_v35 }
 0x2cd   : > { %v571_v38 = vmul.f32 %v569_v26, %v566_v36  ;;  %v551_v39 = vmul.f32 %v549_v25, %v546_v37  ;;  %v611_v43 = vmul.f32 %v609_v29, %v606_v40  ;;  %v591_v44 = vmul.f32 %v589_v27, %v586_v41 }
 0x2ce   : > { %v631_v47 = vmul.f32 %v629_v31, %v626_v45 }
 0x2cf   : > { %573 = vrot.lane.b32.xlu1 %v571_v38, %s1223_s27  ;;  %553 = vrot.lane.b32.xlu0 %v551_v39, %s1224_s28 }
 0x2d3   : > { %613 = vrot.lane.b32.xlu1 %v611_v43, %s1225_s29  ;;  %593 = vrot.lane.b32.xlu0 %v591_v44, %s1226_s30 }
 0x2d7   : > { %633 = vrot.lane.b32.xlu0 %v631_v47, %s1203_s23  ;;  %700 = vperm.xlu1 %1184, %v697_v46  }
 0x2da   : > { %v649_v50 = vpop.permute.xlu1 %648 }
 0x2db   : > { %v651_v51 = vmul.f32 %v649_v50, %v646_v49 }
 0x2dd   : > { %653 = vrot.lane.b32.xlu0 %v651_v51, %s1227_s15 }
 0x2df   : > { %v669_v52 = vpop.permute.xlu1 %668 }
 0x2e4   : > { %v689_v56 = vpop.permute.xlu1 %688 }
 0x2e5   : > { %v691_v57 = vmul.f32 %v689_v56, %v686_v54 }
 0x2e7   : > { %693 = vrot.lane.b32.xlu0 %v691_v57, %s1229_s16 }
 0x2e8   : > { %v1489_v58 = vpop.permute.xlu1 %663 }
 0x2e9   : > { %v666_v59 = vmul.f32 %v1489_v58, %v536_v35 }
 0x2eb   : > { %v671_v60 = vmul.f32 %v669_v52, %v666_v59 }
 0x2ec   : > { %v527_v63 = vpop.permute.xlu1 %526 }
 0x2ed   : > { %673 = vrot.lane.b32.xlu1 %v671_v60, %s1231_s20  ;;  %v529_v2 = vmul.f32 %v1420_v11, %v527_v63  ;;  %v704_v11 = vld [vmem:[%s1555_s5] sm:$0xff] }
 0x2f1   : > { %708 = vperm.xlu1 %1184, %v705_v61  }
 0x2f5   : > { %805 = vperm.xlu1 %1184, %v790_v62  }
 0x2f9   : > { %1186 = vset.pattern.permute.xlu1 %v1208_v6 }
 0x2fa   : > { %838 = vperm.xlu1 %1186, %v790_v62  }
 0x2fe   : > { %1187 = vset.pattern.permute.xlu1 %v1209_v7 }
 0x341   : > { %v554_v1 = vpop.permute.xlu0 %553  ;;  %v574_v0 = vpop.permute.xlu1 %573 }
 0x342   : > { %v556_v3 = vadd.f32 %v554_v1, %v529_v2 }
 0x344   : > { %v576_v9 = vadd.f32 %v574_v0, %v556_v3 }
 0x345   : > { %v594_v10 = vpop.permute.xlu0 %593  ;;  %v614_v13 = vpop.permute.xlu1 %613 }
 0x346   : > { %v596_v12 = vadd.f32 %v594_v10, %v576_v9 }
 0x348   : > { %v616_v15 = vadd.f32 %v614_v13, %v596_v12 }
 0x349   : > { %v634_v14 = vpop.permute.xlu0 %633 }
 0x34a   : > { %v636_v18 = vadd.f32 %v634_v14, %v616_v15 }
 0x34f   : > { %v654_v17 = vpop.permute.xlu0 %653 }
 0x350   : > { %v656_v19 = vadd.f32 %v654_v17, %v636_v18  ;;  %v898_v17 = vld [vmem:[%s1559_s9] sm:$0xff] }
 0x356   : > { %v701_v16 = vpop.permute.xlu1 %700 }
 0x359   : > { %v694_v23 = vpop.permute.xlu0 %693 }
 0x35f   : > { %v674_v6 = vpop.permute.xlu1 %673 }
 0x360   : > { %v676_v20 = vadd.f32 %v674_v6, %v656_v19 }
 0x362   : > { %v696_v7 = vadd.f32 %v694_v23, %v676_v20 }
 0x364   : > { %v703_v25 = vadd.f32 %v701_v16, %v696_v7 }
 0x366   : > { %1097 = vmatpush3.msk.msra.mxu1 %vm715_vm4, %v703_v25 }
 0x367   : > { %1099 = vmatmul.mubr.msk.f32.vlgmr.msra.gmra.mrb[0].mxu1 %vm711_vm5, %v704_v11  ;;  %1101 = vmatprep.subr.mxu1 %v1228_v55 }
 0x368   : > { %1103 = vmatprep.mubr.msk.f32.mxu1 %vm1230_vm3, %v1228_v55 }
 0x370   : > { %v709_v26 = vpop.permute.xlu1 %708 }
 0x43a   : > { %v785_v27 = vpop.f32.mrb[0].mxu1 }
 0x43b   : > { %v786_v29 = vadd.f32 %v785_v27, %v709_v26  ;;  %v1100_v31 = vpop.f32.mrb[1].mxu1 }
 0x43d   : > { %v789_v33 = vmax.f32 %v786_v29, 0.0 }
 0x43f   : > { %797 = vrot.lane.b32.xlu0 %v789_v33, %s1211_s12 }
 0x443   : > { %816 = vperm.xlu0 %1176, %v790_v62  }
 0x447   : > { %1185 = vset.pattern.permute.xlu0 %v1207_v5  ;;  %v806_v5 = vpop.permute.xlu1 %805 }
 0x448   : > { %827 = vperm.xlu0 %1185, %v790_v62  }
 0x44c   : > { %1188 = vset.pattern.permute.xlu0 %v1210_v8  ;;  %v839_v8 = vpop.permute.xlu1 %838 }
 0x44d   : > { %860 = vperm.xlu0 %1188, %v790_v62  }
 0x451   : > { %1191 = vset.pattern.permute.xlu0 %v1222_v24 }
 0x452   : > { %793 = vperm.xlu0 %1191, %v790_v62  }
 0x456   : > { %1193 = vset.pattern.permute.xlu0 %v1206_v4 }
 0x4b1   : > { %v798_v35 = vpop.permute.xlu0 %797 }
 0x4b2   : > { %v799_v36 = vsel %vm530_vm2, %v798_v35, %v789_v33 }
 0x4b3   : > { %800 = vrot.lane.b32.xlu1 %v799_v36, %s1211_s12 }
 0x4b7   : > { %849 = vperm.xlu1 %1187, %v790_v62  }
 0x4bb   : > { %1189 = vset.pattern.permute.xlu1 %v1219_v21 }
 0x4bc   : > { %871 = vperm.xlu1 %1189, %v790_v62  }
 0x4c0   : > { %1190 = vset.pattern.permute.xlu1 %v1220_v22 }
 0x4c1   : > { %882 = vperm.xlu1 %1190, %v790_v62  }
 0x4c2   : > { %v817_v24 = vpop.permute.xlu0 %816 }
 0x4c5   : > { %1192 = vset.pattern.permute.xlu1 %v1206_v4 }
 0x4c7   : > { %v828_v41 = vpop.permute.xlu0 %827 }
 0x4cc   : > { %v861_v49 = vpop.permute.xlu0 %860 }
 0x4d1   : > { %v794_v57 = vpop.permute.xlu0 %793 }
 0x525   : > { %v801_v37 = vpop.permute.xlu1 %800 }
 0x526   : > { %v802_v38 = vsel %vm530_vm2, %v801_v37, %v789_v33 }
 0x527   : > { %v825_v39 = vmul.f32 %v802_v38, %v1459_v32  ;;  %v803_v40 = vmul.f32 %v802_v38, %v1455_v28  ;;  %v814_v21 = vmul.f32 %v802_v38, %v1457_v30  ;;  %v836_v22 = vmul.f32 %v802_v38, %v1461_v34  ;;  %v891_v28 = vld [vmem:[%s1558_s8] sm:$0xff] }
 0x528   : > { %v847_v32 = vmul.f32 %v802_v38, %v1471_v42  ;;  %v858_v47 = vmul.f32 %v802_v38, %v1480_v48  ;;  %v869_v34 = vmul.f32 %v802_v38, %v1489_v58  ;;  %v880_v54 = vmul.f32 %v802_v38, %v1484_v53  ;;  %v899_v42 = vld [vmem:[%s1560_s10] sm:$0xff] }
 0x529   : > { %v830_v43 = vmul.f32 %v828_v41, %v825_v39  ;;  %v808_v44 = vmul.f32 %v806_v5, %v803_v40  ;;  %v819_v4 = vmul.f32 %v817_v24, %v814_v21  ;;  %v841_v45 = vmul.f32 %v839_v8, %v836_v22 }
 0x52a   : > { %v863_v51 = vmul.f32 %v861_v49, %v858_v47  ;;  %v796_v58 = vmul.f32 %v794_v57, %v789_v33 }
 0x52b   : > { %832 = vrot.lane.b32.xlu0 %v830_v43, %s1226_s30  ;;  %810 = vrot.lane.b32.xlu1 %v808_v44, %s1224_s28 }
 0x52f   : > { %821 = vrot.lane.b32.xlu1 %v819_v4, %s1223_s27 }
 0x533   : > { %843 = vrot.lane.b32.xlu1 %v841_v45, %s1225_s29 }
 0x536   : > { %v850_v46 = vpop.permute.xlu1 %849 }
 0x537   : > { %v852_v30 = vmul.f32 %v850_v46, %v847_v32  ;;  %894 = vperm.xlu1 %1192, %v891_v28  }
 0x539   : > { %854 = vrot.lane.b32.xlu0 %v852_v30, %s1203_s23 }
 0x53b   : > { %v872_v50 = vpop.permute.xlu1 %871 }
 0x53c   : > { %v874_v52 = vmul.f32 %v872_v50, %v869_v34 }
 0x53d   : > { %865 = vrot.lane.b32.xlu0 %v863_v51, %s1227_s15 }
 0x53e   : > { %876 = vrot.lane.b32.xlu1 %v874_v52, %s1231_s20 }
 0x540   : > { %v883_v55 = vpop.permute.xlu1 %882 }
 0x541   : > { %v885_v48 = vmul.f32 %v883_v55, %v880_v54 }
 0x542   : > { %902 = vperm.xlu1 %1192, %v899_v42  }
 0x543   : > { %887 = vrot.lane.b32.xlu0 %v885_v48, %s1229_s16  ;;  %s384_s16 = scalar_lea.vmem %s1561_s11, %s1056_s19 }
 0x59d   : > { %v811_v56 = vpop.permute.xlu1 %810  ;;  %v833_v61 = vpop.permute.xlu0 %832 }
 0x59e   : > { %v813_v60 = vadd.f32 %v811_v56, %v796_v58 }
 0x5a1   : > { %v822_v59 = vpop.permute.xlu1 %821 }
 0x5a2   : > { %v824_v62 = vadd.f32 %v822_v59, %v813_v60 }
 0x5a4   : > { %v835_v1 = vadd.f32 %v833_v61, %v824_v62 }
 0x5a5   : > { %v844_v2 = vpop.permute.xlu1 %843 }
 0x5a6   : > { %v846_v53 = vadd.f32 %v844_v2, %v835_v1 }
 0x5ab   : > { %v855_v63 = vpop.permute.xlu0 %854 }
 0x5ac   : > { %v857_v9 = vadd.f32 %v855_v63, %v846_v53 }
 0x5af   : > { %v866_v3 = vpop.permute.xlu0 %865 }
 0x5b0   : > { %v868_v10 = vadd.f32 %v866_v3, %v857_v9 }
 0x5b5   : > { %v888_v14 = vpop.permute.xlu0 %887 }
 0x5b6   : > { %v895_v0 = vpop.permute.xlu1 %894 }
 0x5ba   : > { %v877_v12 = vpop.permute.xlu1 %876 }
 0x5bb   : > { %v879_v13 = vadd.f32 %v877_v12, %v868_v10 }
 0x5bd   : > { %v890_v15 = vadd.f32 %v888_v14, %v879_v13 }
 0x5bf   : > { %v897_v16 = vadd.f32 %v895_v0, %v890_v15 }
 0x5c1   : > { %1102 = vmatpush3.msra.mxu1 %v897_v16  ;;  %v903_v18 = vpop.permute.xlu1 %902 }
 0x5c2   : > { %1104 = vmatmul.mubr.msk.f32.vlgmr.msra.gmra.mrb[2].mxu1 %vm905_vm6, %v898_v17 }
 0x695   : > { %v975_v19 = vpop.f32.mrb[2].mxu1 }
 0x696   : > { %v976_v6 = vadd.f32 %v975_v19, %v903_v18  ;;  %v1105_v20 = vpop.f32.mrb[3].mxu1 }
 0x698   : > { %v979_v23 = vmax.f32 %v976_v6, 0.0 }
 0x69a   : > { %981 = vst.msk [vmem:[%s384_s16] sm:$0xff] %vm980_vm7, %v979_v23 }
 0x69b PF: > { %s21_s17 = sadd.s32 1, %s1201_s17  }
 0x69c   : > { %p18_p4 = scmp.ge.s32.totalorder %s21_s17, 4  }
 0x69e   :  { %20 = sbr.rel (!%p18_p4) target bundleno = 1 (0x1), region = 94 }

</bundles_post_ra>
